<compile_context>
chip_gen: v6e
topology: v6e:2x2x1
jax: 0.10.0
libtpu: 0.0.40
codegen_flags: <defaults>
</compile_context>

<pallas_src>
import math
import functools

import jax
import jax.numpy as jnp
from jax.experimental import pallas as pl
from jax.experimental.pallas import tpu as pltpu

MXU_DTYPE = jnp.bfloat16          # matmul-input dtype (accumulation is always f32)
VMEM_LIMIT = 64 * 1024 * 1024     # raised scoped-VMEM limit (<= v7x physical 64 MiB)


def _pick_tile(n, preferred):
    """Largest tile from `preferred` that evenly divides n, else n (full extent)."""
    for t in preferred:
        if t <= n and n % t == 0:
            return t
    return n


def _layer_norm(x, w, b, eps=1e-5):
    # Matches torch.nn.LayerNorm: biased variance, eps inside sqrt, affine. f32 math.
    mean = jnp.mean(x, axis=-1, keepdims=True)
    var = jnp.mean(jnp.square(x - mean), axis=-1, keepdims=True)
    return (x - mean) * jax.lax.rsqrt(var + eps) * w + b


def _erf(x):
    # Abramowitz & Stegun 7.1.26 polynomial erf, |abs err| < 1.5e-7 (~f32 eps).
    a1, a2, a3, a4, a5 = 0.254829592, -0.284496736, 1.421413741, -1.453152027, 1.061405429
    p = 0.3275911
    ax = jnp.abs(x)
    t = pl.reciprocal(1.0 + p * ax, approx=True)      # divide on the EUP slot, not VALU
    poly = ((((a5 * t + a4) * t + a3) * t + a2) * t + a1) * t
    y = 1.0 - poly * jnp.exp(-ax * ax)
    return jnp.where(x >= 0, y, -y)


def _gelu_exact(x):
    # torch.nn.GELU() default is the exact erf-based GELU.
    # TODO(synk): lax.erf availability in Mosaic lowering is uncertain; the
    # polynomial erf (~1.5e-7 abs error) is numerically equivalent in f32.
    return 0.5 * x * (1.0 + _erf(x * (1.0 / math.sqrt(2.0))))


# --------------------------- kernel 1: LN + fused QKV ---------------------------
def _ln_qkv_kernel(x_ref, ln_w_ref, ln_b_ref, wqkv_ref, bqkv_ref,
                   q_ref, k_ref, v_ref, *, dq, dkv):
    nx = _layer_norm(x_ref[...].astype(jnp.float32), ln_w_ref[...], ln_b_ref[...])
    # One wide MXU matmul instead of three narrow Q/K/V projections.
    qkv = jnp.dot(nx.astype(wqkv_ref.dtype), wqkv_ref[...],
                  preferred_element_type=jnp.float32) + bqkv_ref[...]
    q_ref[...] = qkv[:, :dq].astype(q_ref.dtype)
    k_ref[...] = qkv[:, dq:dq + dkv].astype(k_ref.dtype)
    v_ref[...] = qkv[:, dq + dkv:].astype(v_ref.dtype)


# --------------------- kernel 2: flash-style GQA attention ----------------------
# TODO(synk): no attention mask (the module's `mask` defaults to None); a masked
# flash path would add a mask tile input and -inf fill before the online softmax.
def _flash_attn_kernel(q_ref, k_ref, v_ref, o_ref, m_sc, l_sc, acc_sc, *, scale):
    ki = pl.program_id(3)

    @pl.when(ki == 0)
    def _init():
        m_sc[...] = jnp.full_like(m_sc, -jnp.inf)
        l_sc[...] = jnp.zeros_like(l_sc)
        acc_sc[...] = jnp.zeros_like(acc_sc)

    q = q_ref[...]                                    # (tq, Dh)  mxu dtype
    k = k_ref[...]                                    # (tk, Dh)
    v = v_ref[...]                                    # (tk, Dh)
    s = jax.lax.dot_general(q, k, (((1,), (1,)), ((), ())),
                            preferred_element_type=jnp.float32) * scale   # (tq, tk)
    m_prev = m_sc[...]
    m_new = jnp.maximum(m_prev, jnp.max(s, axis=-1, keepdims=True))
    alpha = jnp.exp(m_prev - m_new)
    p = jnp.exp(s - m_new)
    l_sc[...] = alpha * l_sc[...] + jnp.sum(p, axis=-1, keepdims=True)
    acc_sc[...] = alpha * acc_sc[...] + jnp.dot(p.astype(v.dtype), v,
                                                preferred_element_type=jnp.float32)
    m_sc[...] = m_new

    @pl.when(ki == pl.num_programs(3) - 1)
    def _finalize():
        o_ref[...] = (acc_sc[...] *
                      pl.reciprocal(l_sc[...], approx=True)).astype(o_ref.dtype)


# -------------- kernel 3: out_proj + residual + LN + MLP + residual --------------
def _out_mlp_kernel(x_ref, attn_ref, wo_ref, bo_ref, ln2_w_ref, ln2_b_ref,
                    w1_ref, b1_ref, w2_ref, b2_ref, out_ref,
                    x1_sc, nx2_sc, acc_sc):
    f = pl.program_id(1)

    @pl.when(f == 0)
    def _init():
        proj = jnp.dot(attn_ref[...].astype(wo_ref.dtype), wo_ref[...],
                       preferred_element_type=jnp.float32) + bo_ref[...]
        x1 = x_ref[...].astype(jnp.float32) + proj
        x1_sc[...] = x1
        nx2_sc[...] = _layer_norm(x1, ln2_w_ref[...], ln2_b_ref[...])
        acc_sc[...] = jnp.zeros_like(acc_sc)

    h = jnp.dot(nx2_sc[...].astype(w1_ref.dtype), w1_ref[...],
                preferred_element_type=jnp.float32) + b1_ref[...]
    h = _gelu_exact(h)
    acc_sc[...] += jnp.dot(h.astype(w2_ref.dtype), w2_ref[...],
                           preferred_element_type=jnp.float32)

    @pl.when(f == pl.num_programs(1) - 1)
    def _finalize():
        out_ref[...] = (x1_sc[...] + acc_sc[...] + b2_ref[...]).astype(out_ref.dtype)


def transformer_layer(x, params, *, num_heads, num_kv_heads, head_dim,
                      mxu_dtype=MXU_DTYPE):
    (ln1_w, ln1_b, wq, bq, wk, bk, wv, bv, wo, bo,
     ln2_w, ln2_b, w1, b1, w2, b2) = params
    B, S, D = x.shape
    H, G, Dh = num_heads, num_kv_heads, head_dim
    rf = H // G
    dq, dkv = H * Dh, G * Dh
    dff = w1.shape[1]
    n_rows = B * S

    # --- offline weight prep: fuse QKV, cast matmul weights to the MXU dtype ----
    wqkv = jnp.concatenate([wq, wk, wv], axis=1).astype(mxu_dtype)   # (D, dq+2*dkv)
    bqkv = jnp.concatenate([bq, bk, bv], axis=1)                     # f32
    wo_m, w1_m, w2_m = wo.astype(mxu_dtype), w1.astype(mxu_dtype), w2.astype(mxu_dtype)

    x2 = x.reshape(n_rows, D)

    # ---------------- kernel 1: LayerNorm + fused QKV projection ----------------
    tr = _pick_tile(n_rows, (512, 256, 128, 64, 32, 16, 8))
    q2, k2, v2 = pl.pallas_call(
        functools.partial(_ln_qkv_kernel, dq=dq, dkv=dkv),
        grid=(n_rows // tr,),
        in_specs=[
            pl.BlockSpec((tr, D), lambda r: (r, 0)),
            pl.BlockSpec((1, D), lambda r: (0, 0)),
            pl.BlockSpec((1, D), lambda r: (0, 0)),
            pl.BlockSpec((D, dq + 2 * dkv), lambda r: (0, 0)),  # weights stay resident
            pl.BlockSpec((1, dq + 2 * dkv), lambda r: (0, 0)),
        ],
        out_specs=[
            pl.BlockSpec((tr, dq), lambda r: (r, 0)),
            pl.BlockSpec((tr, dkv), lambda r: (r, 0)),
            pl.BlockSpec((tr, dkv), lambda r: (r, 0)),
        ],
        out_shape=[
            jax.ShapeDtypeStruct((n_rows, dq), mxu_dtype),
            jax.ShapeDtypeStruct((n_rows, dkv), mxu_dtype),
            jax.ShapeDtypeStruct((n_rows, dkv), mxu_dtype),
        ],
        compiler_params=pltpu.CompilerParams(
            dimension_semantics=("parallel",), vmem_limit_bytes=VMEM_LIMIT),
    )(x2, ln1_w, ln1_b, wqkv, bqkv)

    # --- layout plumbing (XLA side): group-major Q/K/V for lane-dense attention ---
    # Q: (B*S, H*Dh) -> (B, G, rf*S, Dh): the rf query heads sharing a KV group are
    # stacked along rows, so the kernel never slices / concatenates along heads.
    q_hm = q2.reshape(B, S, G, rf, Dh).transpose(0, 2, 3, 1, 4).reshape(B, G, rf * S, Dh)
    k_hm = k2.reshape(B, S, G, Dh).transpose(0, 2, 1, 3)             # (B, G, S, Dh)
    v_hm = v2.reshape(B, S, G, Dh).transpose(0, 2, 1, 3)

    # ---------------- kernel 2: flash-style GQA attention -----------------------
    # TODO(synk): for small head_dim (e.g. 8) the MXU contraction depth is mostly
    # idle; zero-padding Dh up to 128 would improve MXU fill at extra DMA cost.
    tq = _pick_tile(rf * S, (512, 256, 128, 64, 32, 16, 8))
    tk = _pick_tile(S, (512, 256, 128, 64, 32, 16, 8))
    attn_hm = pl.pallas_call(
        functools.partial(_flash_attn_kernel, scale=1.0 / math.sqrt(Dh)),
        grid=(B, G, (rf * S) // tq, S // tk),   # reduction (kv) axis last
        in_specs=[
            pl.BlockSpec((None, None, tq, Dh), lambda b, g, qi, ki: (b, g, qi, 0)),
            pl.BlockSpec((None, None, tk, Dh), lambda b, g, qi, ki: (b, g, ki, 0)),
            pl.BlockSpec((None, None, tk, Dh), lambda b, g, qi, ki: (b, g, ki, 0)),
        ],
        out_specs=pl.BlockSpec((None, None, tq, Dh),
                               lambda b, g, qi, ki: (b, g, qi, 0)),
        out_shape=jax.ShapeDtypeStruct((B, G, rf * S, Dh), mxu_dtype),
        scratch_shapes=[
            pltpu.VMEM((tq, 1), jnp.float32),    # running max
            pltpu.VMEM((tq, 1), jnp.float32),    # running denom
            pltpu.VMEM((tq, Dh), jnp.float32),   # f32 output accumulator
        ],
        compiler_params=pltpu.CompilerParams(
            dimension_semantics=("parallel", "parallel", "parallel", "arbitrary"),
            vmem_limit_bytes=VMEM_LIMIT),
    )(q_hm, k_hm, v_hm)

    # Back to token-major (B*S, H*Dh): matches torch's .transpose(1,2).view_as(x).
    attn2 = attn_hm.reshape(B, G, rf, S, Dh).transpose(0, 3, 1, 2, 4).reshape(n_rows, dq)

    # --------- kernel 3: out_proj + residual + LayerNorm + MLP + residual --------
    tf = _pick_tile(dff, (1024, 512, 256, 128))
    out2 = pl.pallas_call(
        _out_mlp_kernel,
        grid=(n_rows // tr, dff // tf),          # ff reduction axis last
        in_specs=[
            pl.BlockSpec((tr, D), lambda r, f: (r, 0)),     # x rows
            pl.BlockSpec((tr, dq), lambda r, f: (r, 0)),    # attention rows
            pl.BlockSpec((dq, D), lambda r, f: (0, 0)),     # wo (resident)
            pl.BlockSpec((1, D), lambda r, f: (0, 0)),      # bo
            pl.BlockSpec((1, D), lambda r, f: (0, 0)),      # ln2_w
            pl.BlockSpec((1, D), lambda r, f: (0, 0)),      # ln2_b
            pl.BlockSpec((D, tf), lambda r, f: (0, f)),     # w1 tile (over Dff)
            pl.BlockSpec((1, tf), lambda r, f: (0, f)),     # b1 tile
            pl.BlockSpec((tf, D), lambda r, f: (f, 0)),     # w2 tile (over Dff)
            pl.BlockSpec((1, D), lambda r, f: (0, 0)),      # b2
        ],
        out_specs=pl.BlockSpec((tr, D), lambda r, f: (r, 0)),
        out_shape=jax.ShapeDtypeStruct((n_rows, D), x.dtype),
        scratch_shapes=[
            pltpu.VMEM((tr, D), jnp.float32),   # x + attn_out (residual)
            pltpu.VMEM((tr, D), jnp.float32),   # mlp_norm(x1)
            pltpu.VMEM((tr, D), jnp.float32),   # MLP accumulator
        ],
        compiler_params=pltpu.CompilerParams(
            dimension_semantics=("parallel", "arbitrary"),
            vmem_limit_bytes=VMEM_LIMIT),
    )(x2, attn2, wo_m, bo, ln2_w, ln2_b, w1_m, b1, w2_m, b2)

    return out2.reshape(B, S, D)


def init_params(key, embed_dim, num_heads, num_kv_heads, head_dim, intermediate_dim):
    """Deterministic synthetic init (PyTorch-Linear-style uniform bounds)."""
    ks = jax.random.split(key, 6)

    def lin(k, fan_in, fan_out):
        kw, kb = jax.random.split(k)
        bound = 1.0 / math.sqrt(fan_in)
        w = jax.random.uniform(kw, (fan_in, fan_out), jnp.float32, -bound, bound)
        b = jax.random.uniform(kb, (1, fan_out), jnp.float32, -bound, bound)
        return w, b

    wq, bq = lin(ks[0], embed_dim, num_heads * head_dim)
    wk, bk = lin(ks[1], embed_dim, num_kv_heads * head_dim)
    wv, bv = lin(ks[2], embed_dim, num_kv_heads * head_dim)
    wo, bo = lin(ks[3], num_heads * head_dim, embed_dim)
    w1, b1 = lin(ks[4], embed_dim, intermediate_dim)
    w2, b2 = lin(ks[5], intermediate_dim, embed_dim)
    ln1_w = jnp.ones((1, embed_dim), jnp.float32)
    ln1_b = jnp.zeros((1, embed_dim), jnp.float32)
    ln2_w = jnp.ones((1, embed_dim), jnp.float32)
    ln2_b = jnp.zeros((1, embed_dim), jnp.float32)
    return [ln1_w, ln1_b, wq, bq, wk, bk, wv, bv, wo, bo,
            ln2_w, ln2_b, w1, b1, w2, b2]


if __name__ == "__main__":
    embed_dim, num_heads, num_kv_heads, head_dim, intermediate_dim = 32, 4, 2, 8, 64
    B, S = 2, 8

    key = jax.random.PRNGKey(0)
    kx, kp = jax.random.split(key)
    x = jax.random.normal(kx, (B, S, embed_dim), dtype=jnp.float32)
    params = init_params(kp, embed_dim, num_heads, num_kv_heads, head_dim,
                         intermediate_dim)

    fwd = jax.jit(functools.partial(
        transformer_layer, num_heads=num_heads, num_kv_heads=num_kv_heads,
        head_dim=head_dim))
    y = fwd(x, params)
    jax.block_until_ready(y)
    assert y.shape == x.shape and y.dtype == x.dtype
    print("KERNEL_OK")
</pallas_src>

<mosaic_0001>
module attributes {stable_mosaic.version = 11 : i64} {
  func.func @_ln_qkv_kernel(%arg0: i32, %arg1: memref<16x32xf32, #tpu.memory_space<vmem>>, %arg2: memref<1x32xf32, #tpu.memory_space<vmem>>, %arg3: memref<1x32xf32, #tpu.memory_space<vmem>>, %arg4: memref<32x64xbf16, #tpu.memory_space<vmem>>, %arg5: memref<1x64xf32, #tpu.memory_space<vmem>>, %arg6: memref<16x32xbf16, #tpu.memory_space<vmem>>, %arg7: memref<16x16xbf16, #tpu.memory_space<vmem>>, %arg8: memref<16x16xbf16, #tpu.memory_space<vmem>>) attributes {dimension_semantics = [#tpu.dimension_semantics<parallel>], iteration_bounds = array<i64: 1>, scalar_prefetch = 0 : i64, scratch_operands = 0 : i64, tpu.core_type = #tpu.core_type<tc>, window_params = [{transform_indices = @transform_0, window_bounds = array<i64: 16, 32>}, {pipeline_mode = #tpu.pipeline_mode<synchronous>, transform_indices = @transform_1, window_bounds = array<i64: 1, 32>}, {pipeline_mode = #tpu.pipeline_mode<synchronous>, transform_indices = @transform_2, window_bounds = array<i64: 1, 32>}, {pipeline_mode = #tpu.pipeline_mode<synchronous>, transform_indices = @transform_3, window_bounds = array<i64: 32, 64>}, {pipeline_mode = #tpu.pipeline_mode<synchronous>, transform_indices = @transform_4, window_bounds = array<i64: 1, 64>}, {transform_indices = @transform_5, window_bounds = array<i64: 16, 32>}, {transform_indices = @transform_6, window_bounds = array<i64: 16, 16>}, {transform_indices = @transform_7, window_bounds = array<i64: 16, 16>}]} {
    %c0 = arith.constant 0 : index
    %c0_0 = arith.constant 0 : index
    %0 = vector.load %arg1[%c0, %c0_0] : memref<16x32xf32, #tpu.memory_space<vmem>>, vector<16x32xf32>
    %c0_1 = arith.constant 0 : index
    %c0_2 = arith.constant 0 : index
    %1 = vector.load %arg2[%c0_1, %c0_2] : memref<1x32xf32, #tpu.memory_space<vmem>>, vector<1x32xf32>
    %c0_3 = arith.constant 0 : index
    %c0_4 = arith.constant 0 : index
    %2 = vector.load %arg3[%c0_3, %c0_4] : memref<1x32xf32, #tpu.memory_space<vmem>>, vector<1x32xf32>
    %cst = arith.constant dense<0.000000e+00> : vector<16xf32>
    %3 = vector.multi_reduction <add>, %0, %cst [1] : vector<16x32xf32> to vector<16xf32>
    %4 = vector.shape_cast %3 : vector<16xf32> to vector<16x1xf32>
    %cst_5 = arith.constant 3.200000e+01 : f32
    %5 = vector.broadcast %cst_5 : f32 to vector<16x1xf32>
    %6 = arith.divf %4, %5 : vector<16x1xf32>
    %7 = vector.broadcast %6 : vector<16x1xf32> to vector<16x32xf32>
    %8 = arith.subf %0, %7 : vector<16x32xf32>
    %9 = arith.mulf %8, %8 : vector<16x32xf32>
    %cst_6 = arith.constant dense<0.000000e+00> : vector<16xf32>
    %10 = vector.multi_reduction <add>, %9, %cst_6 [1] : vector<16x32xf32> to vector<16xf32>
    %11 = vector.shape_cast %10 : vector<16xf32> to vector<16x1xf32>
    %cst_7 = arith.constant 3.200000e+01 : f32
    %12 = vector.broadcast %cst_7 : f32 to vector<16x1xf32>
    %13 = arith.divf %11, %12 : vector<16x1xf32>
    %14 = vector.broadcast %6 : vector<16x1xf32> to vector<16x32xf32>
    %15 = arith.subf %0, %14 : vector<16x32xf32>
    %cst_8 = arith.constant 9.99999974E-6 : f32
    %16 = vector.broadcast %cst_8 : f32 to vector<16x1xf32>
    %17 = arith.addf %13, %16 : vector<16x1xf32>
    %18 = math.rsqrt %17 : vector<16x1xf32>
    %19 = vector.broadcast %18 : vector<16x1xf32> to vector<16x32xf32>
    %20 = arith.mulf %15, %19 : vector<16x32xf32>
    %21 = vector.broadcast %1 : vector<1x32xf32> to vector<16x32xf32>
    %22 = arith.mulf %20, %21 : vector<16x32xf32>
    %23 = vector.broadcast %2 : vector<1x32xf32> to vector<16x32xf32>
    %24 = arith.addf %22, %23 : vector<16x32xf32>
    %25 = arith.truncf %24 : vector<16x32xf32> to vector<16x32xbf16>
    %c0_9 = arith.constant 0 : index
    %c0_10 = arith.constant 0 : index
    %26 = vector.load %arg4[%c0_9, %c0_10] : memref<32x64xbf16, #tpu.memory_space<vmem>>, vector<32x64xbf16>
    %cst_11 = arith.constant dense<0.000000e+00> : vector<16x64xf32>
    %27 = tpu.matmul %25, %26, %cst_11 {dimension_numbers = #tpu.dot_dimension_numbers<[1], [0], [0], [1], [0, 0, 1, 1], [], []>} : vector<16x32xbf16>, vector<32x64xbf16>, vector<16x64xf32> -> vector<16x64xf32>
    %c0_12 = arith.constant 0 : index
    %c0_13 = arith.constant 0 : index
    %28 = vector.load %arg5[%c0_12, %c0_13] : memref<1x64xf32, #tpu.memory_space<vmem>>, vector<1x64xf32>
    %29 = vector.broadcast %28 : vector<1x64xf32> to vector<16x64xf32>
    %30 = arith.addf %27, %29 : vector<16x64xf32>
    %31 = vector.extract_strided_slice %30 {offsets = [0, 0], sizes = [16, 32], strides = [1, 1]} : vector<16x64xf32> to vector<16x32xf32>
    %32 = arith.truncf %31 : vector<16x32xf32> to vector<16x32xbf16>
    %c0_14 = arith.constant 0 : index
    %c0_15 = arith.constant 0 : index
    %33 = vector.load %arg6[%c0_14, %c0_15] : memref<16x32xbf16, #tpu.memory_space<vmem>>, vector<16x32xbf16>
    tpu.vector_store %arg6[%c0_14, %c0_15], %32 {strides = array<i32>} : memref<16x32xbf16, #tpu.memory_space<vmem>>, vector<16x32xbf16>,
    %34 = vector.extract_strided_slice %30 {offsets = [0, 32], sizes = [16, 16], strides = [1, 1]} : vector<16x64xf32> to vector<16x16xf32>
    %35 = arith.truncf %34 : vector<16x16xf32> to vector<16x16xbf16>
    %c0_16 = arith.constant 0 : index
    %c0_17 = arith.constant 0 : index
    %36 = vector.load %arg7[%c0_16, %c0_17] : memref<16x16xbf16, #tpu.memory_space<vmem>>, vector<16x16xbf16>
    tpu.vector_store %arg7[%c0_16, %c0_17], %35 {strides = array<i32>} : memref<16x16xbf16, #tpu.memory_space<vmem>>, vector<16x16xbf16>,
    %37 = vector.extract_strided_slice %30 {offsets = [0, 48], sizes = [16, 16], strides = [1, 1]} : vector<16x64xf32> to vector<16x16xf32>
    %38 = arith.truncf %37 : vector<16x16xf32> to vector<16x16xbf16>
    %c0_18 = arith.constant 0 : index
    %c0_19 = arith.constant 0 : index
    %39 = vector.load %arg8[%c0_18, %c0_19] : memref<16x16xbf16, #tpu.memory_space<vmem>>, vector<16x16xbf16>
    tpu.vector_store %arg8[%c0_18, %c0_19], %38 {strides = array<i32>} : memref<16x16xbf16, #tpu.memory_space<vmem>>, vector<16x16xbf16>,
    return
  }
  func.func @transform_0(%arg0: i32) -> (i32, i32) {
    %c0_i32 = arith.constant 0 : i32
    %c0_i32_0 = arith.constant 0 : i32
    return %arg0, %c0_i32 : i32, i32
  }
  func.func @transform_1(%arg0: i32) -> (i32, i32) {
    %c0_i32 = arith.constant 0 : i32
    %c0_i32_0 = arith.constant 0 : i32
    %c0_i32_1 = arith.constant 0 : i32
    return %c0_i32, %c0_i32_0 : i32, i32
  }
  func.func @transform_2(%arg0: i32) -> (i32, i32) {
    %c0_i32 = arith.constant 0 : i32
    %c0_i32_0 = arith.constant 0 : i32
    %c0_i32_1 = arith.constant 0 : i32
    return %c0_i32, %c0_i32_0 : i32, i32
  }
  func.func @transform_3(%arg0: i32) -> (i32, i32) {
    %c0_i32 = arith.constant 0 : i32
    %c0_i32_0 = arith.constant 0 : i32
    %c0_i32_1 = arith.constant 0 : i32
    return %c0_i32, %c0_i32_0 : i32, i32
  }
  func.func @transform_4(%arg0: i32) -> (i32, i32) {
    %c0_i32 = arith.constant 0 : i32
    %c0_i32_0 = arith.constant 0 : i32
    %c0_i32_1 = arith.constant 0 : i32
    return %c0_i32, %c0_i32_0 : i32, i32
  }
  func.func @transform_5(%arg0: i32) -> (i32, i32) {
    %c0_i32 = arith.constant 0 : i32
    %c0_i32_0 = arith.constant 0 : i32
    return %arg0, %c0_i32 : i32, i32
  }
  func.func @transform_6(%arg0: i32) -> (i32, i32) {
    %c0_i32 = arith.constant 0 : i32
    %c0_i32_0 = arith.constant 0 : i32
    return %arg0, %c0_i32 : i32, i32
  }
  func.func @transform_7(%arg0: i32) -> (i32, i32) {
    %c0_i32 = arith.constant 0 : i32
    %c0_i32_0 = arith.constant 0 : i32
    return %arg0, %c0_i32 : i32, i32
  }
}

module attributes {stable_mosaic.version = 11 : i64} {
  func.func @_flash_attn_kernel(%arg0: i32, %arg1: i32, %arg2: i32, %arg3: i32, %arg4: memref<1x1x16x8xbf16, #tpu.memory_space<vmem>>, %arg5: memref<1x1x8x8xbf16, #tpu.memory_space<vmem>>, %arg6: memref<1x1x8x8xbf16, #tpu.memory_space<vmem>>, %arg7: memref<1x1x16x8xbf16, #tpu.memory_space<vmem>>, %arg8: memref<16x1xf32, #tpu.memory_space<vmem>>, %arg9: memref<16x1xf32, #tpu.memory_space<vmem>>, %arg10: memref<16x8xf32, #tpu.memory_space<vmem>>) attributes {dimension_semantics = [#tpu.dimension_semantics<parallel>, #tpu.dimension_semantics<parallel>, #tpu.dimension_semantics<parallel>, #tpu.dimension_semantics<arbitrary>], iteration_bounds = array<i64: 2, 2, 1, 1>, scalar_prefetch = 0 : i64, scratch_operands = 3 : i64, tpu.core_type = #tpu.core_type<tc>, window_params = [{transform_indices = @transform_0, window_bounds = array<i64: 1, 1, 16, 8>}, {transform_indices = @transform_1, window_bounds = array<i64: 1, 1, 8, 8>}, {transform_indices = @transform_2, window_bounds = array<i64: 1, 1, 8, 8>}, {transform_indices = @transform_3, window_bounds = array<i64: 1, 1, 16, 8>}]} {
    %c0_i32 = arith.constant 0 : i32
    %0 = arith.cmpi eq, %arg3, %c0_i32 : i32
    %1 = arith.extui %0 : i1 to i32
    %c0_i32_0 = arith.constant 0 : i32
    %2 = arith.cmpi ne, %1, %c0_i32_0 : i32
    scf.if %2 {
      %cst_30 = arith.constant 0xFF800000 : f32
      %38 = vector.broadcast %cst_30 : f32 to vector<16x1xf32>
      %c0_31 = arith.constant 0 : index
      %c0_32 = arith.constant 0 : index
      %39 = vector.load %arg8[%c0_31, %c0_32] : memref<16x1xf32, #tpu.memory_space<vmem>>, vector<16x1xf32>
      tpu.vector_store %arg8[%c0_31, %c0_32], %38 {strides = array<i32>} : memref<16x1xf32, #tpu.memory_space<vmem>>, vector<16x1xf32>,
      %cst_33 = arith.constant 0.000000e+00 : f32
      %40 = vector.broadcast %cst_33 : f32 to vector<16x1xf32>
      %c0_34 = arith.constant 0 : index
      %c0_35 = arith.constant 0 : index
      %41 = vector.load %arg9[%c0_34, %c0_35] : memref<16x1xf32, #tpu.memory_space<vmem>>, vector<16x1xf32>
      tpu.vector_store %arg9[%c0_34, %c0_35], %40 {strides = array<i32>} : memref<16x1xf32, #tpu.memory_space<vmem>>, vector<16x1xf32>,
      %cst_36 = arith.constant 0.000000e+00 : f32
      %42 = vector.broadcast %cst_36 : f32 to vector<16x8xf32>
      %c0_37 = arith.constant 0 : index
      %c0_38 = arith.constant 0 : index
      %43 = vector.load %arg10[%c0_37, %c0_38] : memref<16x8xf32, #tpu.memory_space<vmem>>, vector<16x8xf32>
      tpu.vector_store %arg10[%c0_37, %c0_38], %42 {strides = array<i32>} : memref<16x8xf32, #tpu.memory_space<vmem>>, vector<16x8xf32>,
    } else {
    }
    %c0 = arith.constant 0 : index
    %c0_1 = arith.constant 0 : index
    %c0_2 = arith.constant 0 : index
    %c0_3 = arith.constant 0 : index
    %3 = vector.load %arg4[%c0, %c0_1, %c0_2, %c0_3] : memref<1x1x16x8xbf16, #tpu.memory_space<vmem>>, vector<1x1x16x8xbf16>
    %4 = vector.shape_cast %3 : vector<1x1x16x8xbf16> to vector<16x8xbf16>
    %c0_4 = arith.constant 0 : index
    %c0_5 = arith.constant 0 : index
    %c0_6 = arith.constant 0 : index
    %c0_7 = arith.constant 0 : index
    %5 = vector.load %arg5[%c0_4, %c0_5, %c0_6, %c0_7] : memref<1x1x8x8xbf16, #tpu.memory_space<vmem>>, vector<1x1x8x8xbf16>
    %6 = vector.shape_cast %5 : vector<1x1x8x8xbf16> to vector<8x8xbf16>
    %c0_8 = arith.constant 0 : index
    %c0_9 = arith.constant 0 : index
    %c0_10 = arith.constant 0 : index
    %c0_11 = arith.constant 0 : index
    %7 = vector.load %arg6[%c0_8, %c0_9, %c0_10, %c0_11] : memref<1x1x8x8xbf16, #tpu.memory_space<vmem>>, vector<1x1x8x8xbf16>
    %8 = vector.shape_cast %7 : vector<1x1x8x8xbf16> to vector<8x8xbf16>
    %cst = arith.constant dense<0.000000e+00> : vector<16x8xf32>
    %9 = tpu.matmul %4, %6, %cst {dimension_numbers = #tpu.dot_dimension_numbers<[1], [1], [0], [0], [0, 0, 1, 0], [], []>} : vector<16x8xbf16>, vector<8x8xbf16>, vector<16x8xf32> -> vector<16x8xf32>
    %cst_12 = arith.constant 0.353553385 : f32
    %10 = vector.broadcast %cst_12 : f32 to vector<16x8xf32>
    %11 = arith.mulf %9, %10 : vector<16x8xf32>
    %c0_13 = arith.constant 0 : index
    %c0_14 = arith.constant 0 : index
    %12 = vector.load %arg8[%c0_13, %c0_14] : memref<16x1xf32, #tpu.memory_space<vmem>>, vector<16x1xf32>
    %cst_15 = arith.constant dense<0xFF800000> : vector<16xf32>
    %13 = vector.multi_reduction <maximumf>, %11, %cst_15 [1] : vector<16x8xf32> to vector<16xf32>
    %14 = vector.shape_cast %13 : vector<16xf32> to vector<16x1xf32>
    %15 = arith.maximumf %12, %14 : vector<16x1xf32>
    %16 = arith.subf %12, %15 : vector<16x1xf32>
    %17 = math.exp %16 : vector<16x1xf32>
    %18 = vector.broadcast %15 : vector<16x1xf32> to vector<16x8xf32>
    %19 = arith.subf %11, %18 : vector<16x8xf32>
    %20 = math.exp %19 : vector<16x8xf32>
    %c0_16 = arith.constant 0 : index
    %c0_17 = arith.constant 0 : index
    %21 = vector.load %arg9[%c0_16, %c0_17] : memref<16x1xf32, #tpu.memory_space<vmem>>, vector<16x1xf32>
    %22 = arith.mulf %17, %21 : vector<16x1xf32>
    %cst_18 = arith.constant dense<0.000000e+00> : vector<16xf32>
    %23 = vector.multi_reduction <add>, %20, %cst_18 [1] : vector<16x8xf32> to vector<16xf32>
    %24 = vector.shape_cast %23 : vector<16xf32> to vector<16x1xf32>
    %25 = arith.addf %22, %24 : vector<16x1xf32>
    %c0_19 = arith.constant 0 : index
    %c0_20 = arith.constant 0 : index
    %26 = vector.load %arg9[%c0_19, %c0_20] : memref<16x1xf32, #tpu.memory_space<vmem>>, vector<16x1xf32>
    tpu.vector_store %arg9[%c0_19, %c0_20], %25 {strides = array<i32>} : memref<16x1xf32, #tpu.memory_space<vmem>>, vector<16x1xf32>,
    %c0_21 = arith.constant 0 : index
    %c0_22 = arith.constant 0 : index
    %27 = vector.load %arg10[%c0_21, %c0_22] : memref<16x8xf32, #tpu.memory_space<vmem>>, vector<16x8xf32>
    %28 = vector.broadcast %17 : vector<16x1xf32> to vector<16x8xf32>
    %29 = arith.mulf %28, %27 : vector<16x8xf32>
    %30 = arith.truncf %20 : vector<16x8xf32> to vector<16x8xbf16>
    %cst_23 = arith.constant dense<0.000000e+00> : vector<16x8xf32>
    %31 = tpu.matmul %30, %8, %cst_23 {dimension_numbers = #tpu.dot_dimension_numbers<[1], [0], [0], [1], [0, 0, 1, 1], [], []>} : vector<16x8xbf16>, vector<8x8xbf16>, vector<16x8xf32> -> vector<16x8xf32>
    %32 = arith.addf %29, %31 : vector<16x8xf32>
    %c0_24 = arith.constant 0 : index
    %c0_25 = arith.constant 0 : index
    %33 = vector.load %arg10[%c0_24, %c0_25] : memref<16x8xf32, #tpu.memory_space<vmem>>, vector<16x8xf32>
    tpu.vector_store %arg10[%c0_24, %c0_25], %32 {strides = array<i32>} : memref<16x8xf32, #tpu.memory_space<vmem>>, vector<16x8xf32>,
    %c0_26 = arith.constant 0 : index
    %c0_27 = arith.constant 0 : index
    %34 = vector.load %arg8[%c0_26, %c0_27] : memref<16x1xf32, #tpu.memory_space<vmem>>, vector<16x1xf32>
    tpu.vector_store %arg8[%c0_26, %c0_27], %15 {strides = array<i32>} : memref<16x1xf32, #tpu.memory_space<vmem>>, vector<16x1xf32>,
    %c0_i32_28 = arith.constant 0 : i32
    %35 = arith.cmpi eq, %arg3, %c0_i32_28 : i32
    %36 = arith.extui %35 : i1 to i32
    %c0_i32_29 = arith.constant 0 : i32
    %37 = arith.cmpi ne, %36, %c0_i32_29 : i32
    scf.if %37 {
      %c0_30 = arith.constant 0 : index
      %c0_31 = arith.constant 0 : index
      %38 = vector.load %arg10[%c0_30, %c0_31] : memref<16x8xf32, #tpu.memory_space<vmem>>, vector<16x8xf32>
      %c0_32 = arith.constant 0 : index
      %c0_33 = arith.constant 0 : index
      %39 = vector.load %arg9[%c0_32, %c0_33] : memref<16x1xf32, #tpu.memory_space<vmem>>, vector<16x1xf32>
      %40 = tpu.reciprocal %39 {approx = true} : vector<16x1xf32> -> vector<16x1xf32>
      %41 = vector.broadcast %40 : vector<16x1xf32> to vector<16x8xf32>
      %42 = arith.mulf %38, %41 : vector<16x8xf32>
      %43 = arith.truncf %42 : vector<16x8xf32> to vector<16x8xbf16>
      %c0_34 = arith.constant 0 : index
      %c0_35 = arith.constant 0 : index
      %c0_36 = arith.constant 0 : index
      %c0_37 = arith.constant 0 : index
      %44 = vector.load %arg7[%c0_34, %c0_35, %c0_36, %c0_37] : memref<1x1x16x8xbf16, #tpu.memory_space<vmem>>, vector<1x1x16x8xbf16>
      %45 = vector.shape_cast %44 : vector<1x1x16x8xbf16> to vector<16x8xbf16>
      %46 = vector.shape_cast %43 : vector<16x8xbf16> to vector<1x1x16x8xbf16>
      tpu.vector_store %arg7[%c0_34, %c0_35, %c0_36, %c0_37], %46 {strides = array<i32>} : memref<1x1x16x8xbf16, #tpu.memory_space<vmem>>, vector<1x1x16x8xbf16>,
    } else {
    }
    return
  }
  func.func @transform_0(%arg0: i32, %arg1: i32, %arg2: i32, %arg3: i32) -> (i32, i32, i32, i32) {
    %c0_i32 = arith.constant 0 : i32
    %c0_i32_0 = arith.constant 0 : i32
    return %arg0, %arg1, %arg2, %c0_i32 : i32, i32, i32, i32
  }
  func.func @transform_1(%arg0: i32, %arg1: i32, %arg2: i32, %arg3: i32) -> (i32, i32, i32, i32) {
    %c0_i32 = arith.constant 0 : i32
    %c0_i32_0 = arith.constant 0 : i32
    return %arg0, %arg1, %arg3, %c0_i32 : i32, i32, i32, i32
  }
  func.func @transform_2(%arg0: i32, %arg1: i32, %arg2: i32, %arg3: i32) -> (i32, i32, i32, i32) {
    %c0_i32 = arith.constant 0 : i32
    %c0_i32_0 = arith.constant 0 : i32
    return %arg0, %arg1, %arg3, %c0_i32 : i32, i32, i32, i32
  }
  func.func @transform_3(%arg0: i32, %arg1: i32, %arg2: i32, %arg3: i32) -> (i32, i32, i32, i32) {
    %c0_i32 = arith.constant 0 : i32
    %c0_i32_0 = arith.constant 0 : i32
    return %arg0, %arg1, %arg2, %c0_i32 : i32, i32, i32, i32
  }
}

module attributes {stable_mosaic.version = 11 : i64} {
  func.func @_out_mlp_kernel(%arg0: i32, %arg1: i32, %arg2: memref<16x32xf32, #tpu.memory_space<vmem>>, %arg3: memref<16x32xbf16, #tpu.memory_space<vmem>>, %arg4: memref<32x32xbf16, #tpu.memory_space<vmem>>, %arg5: memref<1x32xf32, #tpu.memory_space<vmem>>, %arg6: memref<1x32xf32, #tpu.memory_space<vmem>>, %arg7: memref<1x32xf32, #tpu.memory_space<vmem>>, %arg8: memref<32x64xbf16, #tpu.memory_space<vmem>>, %arg9: memref<1x64xf32, #tpu.memory_space<vmem>>, %arg10: memref<64x32xbf16, #tpu.memory_space<vmem>>, %arg11: memref<1x32xf32, #tpu.memory_space<vmem>>, %arg12: memref<16x32xf32, #tpu.memory_space<vmem>>, %arg13: memref<16x32xf32, #tpu.memory_space<vmem>>, %arg14: memref<16x32xf32, #tpu.memory_space<vmem>>, %arg15: memref<16x32xf32, #tpu.memory_space<vmem>>) attributes {dimension_semantics = [#tpu.dimension_semantics<parallel>, #tpu.dimension_semantics<arbitrary>], iteration_bounds = array<i64: 1, 1>, scalar_prefetch = 0 : i64, scratch_operands = 3 : i64, tpu.core_type = #tpu.core_type<tc>, window_params = [{transform_indices = @transform_0, window_bounds = array<i64: 16, 32>}, {transform_indices = @transform_1, window_bounds = array<i64: 16, 32>}, {pipeline_mode = #tpu.pipeline_mode<synchronous>, transform_indices = @transform_2, window_bounds = array<i64: 32, 32>}, {pipeline_mode = #tpu.pipeline_mode<synchronous>, transform_indices = @transform_3, window_bounds = array<i64: 1, 32>}, {pipeline_mode = #tpu.pipeline_mode<synchronous>, transform_indices = @transform_4, window_bounds = array<i64: 1, 32>}, {pipeline_mode = #tpu.pipeline_mode<synchronous>, transform_indices = @transform_5, window_bounds = array<i64: 1, 32>}, {transform_indices = @transform_6, window_bounds = array<i64: 32, 64>}, {transform_indices = @transform_7, window_bounds = array<i64: 1, 64>}, {transform_indices = @transform_8, window_bounds = array<i64: 64, 32>}, {pipeline_mode = #tpu.pipeline_mode<synchronous>, transform_indices = @transform_9, window_bounds = array<i64: 1, 32>}, {transform_indices = @transform_10, window_bounds = array<i64: 16, 32>}]} {
    %c0_i32 = arith.constant 0 : i32
    %0 = arith.cmpi eq, %arg1, %c0_i32 : i32
    %1 = arith.extui %0 : i1 to i32
    %c0_i32_0 = arith.constant 0 : i32
    %2 = arith.cmpi ne, %1, %c0_i32_0 : i32
    scf.if %2 {
      %c0_29 = arith.constant 0 : index
      %c0_30 = arith.constant 0 : index
      %58 = vector.load %arg3[%c0_29, %c0_30] : memref<16x32xbf16, #tpu.memory_space<vmem>>, vector<16x32xbf16>
      %c0_31 = arith.constant 0 : index
      %c0_32 = arith.constant 0 : index
      %59 = vector.load %arg4[%c0_31, %c0_32] : memref<32x32xbf16, #tpu.memory_space<vmem>>, vector<32x32xbf16>
      %cst_33 = arith.constant dense<0.000000e+00> : vector<16x32xf32>
      %60 = tpu.matmul %58, %59, %cst_33 {dimension_numbers = #tpu.dot_dimension_numbers<[1], [0], [0], [1], [0, 0, 1, 1], [], []>} : vector<16x32xbf16>, vector<32x32xbf16>, vector<16x32xf32> -> vector<16x32xf32>
      %c0_34 = arith.constant 0 : index
      %c0_35 = arith.constant 0 : index
      %61 = vector.load %arg5[%c0_34, %c0_35] : memref<1x32xf32, #tpu.memory_space<vmem>>, vector<1x32xf32>
      %62 = vector.broadcast %61 : vector<1x32xf32> to vector<16x32xf32>
      %63 = arith.addf %60, %62 : vector<16x32xf32>
      %c0_36 = arith.constant 0 : index
      %c0_37 = arith.constant 0 : index
      %64 = vector.load %arg2[%c0_36, %c0_37] : memref<16x32xf32, #tpu.memory_space<vmem>>, vector<16x32xf32>
      %65 = arith.addf %64, %63 : vector<16x32xf32>
      %c0_38 = arith.constant 0 : index
      %c0_39 = arith.constant 0 : index
      %66 = vector.load %arg13[%c0_38, %c0_39] : memref<16x32xf32, #tpu.memory_space<vmem>>, vector<16x32xf32>
      tpu.vector_store %arg13[%c0_38, %c0_39], %65 {strides = array<i32>} : memref<16x32xf32, #tpu.memory_space<vmem>>, vector<16x32xf32>,
      %c0_40 = arith.constant 0 : index
      %c0_41 = arith.constant 0 : index
      %67 = vector.load %arg6[%c0_40, %c0_41] : memref<1x32xf32, #tpu.memory_space<vmem>>, vector<1x32xf32>
      %c0_42 = arith.constant 0 : index
      %c0_43 = arith.constant 0 : index
      %68 = vector.load %arg7[%c0_42, %c0_43] : memref<1x32xf32, #tpu.memory_space<vmem>>, vector<1x32xf32>
      %cst_44 = arith.constant dense<0.000000e+00> : vector<16xf32>
      %69 = vector.multi_reduction <add>, %65, %cst_44 [1] : vector<16x32xf32> to vector<16xf32>
      %70 = vector.shape_cast %69 : vector<16xf32> to vector<16x1xf32>
      %cst_45 = arith.constant 3.200000e+01 : f32
      %71 = vector.broadcast %cst_45 : f32 to vector<16x1xf32>
      %72 = arith.divf %70, %71 : vector<16x1xf32>
      %73 = vector.broadcast %72 : vector<16x1xf32> to vector<16x32xf32>
      %74 = arith.subf %65, %73 : vector<16x32xf32>
      %75 = arith.mulf %74, %74 : vector<16x32xf32>
      %cst_46 = arith.constant dense<0.000000e+00> : vector<16xf32>
      %76 = vector.multi_reduction <add>, %75, %cst_46 [1] : vector<16x32xf32> to vector<16xf32>
      %77 = vector.shape_cast %76 : vector<16xf32> to vector<16x1xf32>
      %cst_47 = arith.constant 3.200000e+01 : f32
      %78 = vector.broadcast %cst_47 : f32 to vector<16x1xf32>
      %79 = arith.divf %77, %78 : vector<16x1xf32>
      %80 = vector.broadcast %72 : vector<16x1xf32> to vector<16x32xf32>
      %81 = arith.subf %65, %80 : vector<16x32xf32>
      %cst_48 = arith.constant 9.99999974E-6 : f32
      %82 = vector.broadcast %cst_48 : f32 to vector<16x1xf32>
      %83 = arith.addf %79, %82 : vector<16x1xf32>
      %84 = math.rsqrt %83 : vector<16x1xf32>
      %85 = vector.broadcast %84 : vector<16x1xf32> to vector<16x32xf32>
      %86 = arith.mulf %81, %85 : vector<16x32xf32>
      %87 = vector.broadcast %67 : vector<1x32xf32> to vector<16x32xf32>
      %88 = arith.mulf %86, %87 : vector<16x32xf32>
      %89 = vector.broadcast %68 : vector<1x32xf32> to vector<16x32xf32>
      %90 = arith.addf %88, %89 : vector<16x32xf32>
      %c0_49 = arith.constant 0 : index
      %c0_50 = arith.constant 0 : index
      %91 = vector.load %arg14[%c0_49, %c0_50] : memref<16x32xf32, #tpu.memory_space<vmem>>, vector<16x32xf32>
      tpu.vector_store %arg14[%c0_49, %c0_50], %90 {strides = array<i32>} : memref<16x32xf32, #tpu.memory_space<vmem>>, vector<16x32xf32>,
      %cst_51 = arith.constant 0.000000e+00 : f32
      %92 = vector.broadcast %cst_51 : f32 to vector<16x32xf32>
      %c0_52 = arith.constant 0 : index
      %c0_53 = arith.constant 0 : index
      %93 = vector.load %arg15[%c0_52, %c0_53] : memref<16x32xf32, #tpu.memory_space<vmem>>, vector<16x32xf32>
      tpu.vector_store %arg15[%c0_52, %c0_53], %92 {strides = array<i32>} : memref<16x32xf32, #tpu.memory_space<vmem>>, vector<16x32xf32>,
    } else {
    }
    %c0 = arith.constant 0 : index
    %c0_1 = arith.constant 0 : index
    %3 = vector.load %arg14[%c0, %c0_1] : memref<16x32xf32, #tpu.memory_space<vmem>>, vector<16x32xf32>
    %4 = arith.truncf %3 : vector<16x32xf32> to vector<16x32xbf16>
    %c0_2 = arith.constant 0 : index
    %c0_3 = arith.constant 0 : index
    %5 = vector.load %arg8[%c0_2, %c0_3] : memref<32x64xbf16, #tpu.memory_space<vmem>>, vector<32x64xbf16>
    %cst = arith.constant dense<0.000000e+00> : vector<16x64xf32>
    %6 = tpu.matmul %4, %5, %cst {dimension_numbers = #tpu.dot_dimension_numbers<[1], [0], [0], [1], [0, 0, 1, 1], [], []>} : vector<16x32xbf16>, vector<32x64xbf16>, vector<16x64xf32> -> vector<16x64xf32>
    %c0_4 = arith.constant 0 : index
    %c0_5 = arith.constant 0 : index
    %7 = vector.load %arg9[%c0_4, %c0_5] : memref<1x64xf32, #tpu.memory_space<vmem>>, vector<1x64xf32>
    %8 = vector.broadcast %7 : vector<1x64xf32> to vector<16x64xf32>
    %9 = arith.addf %6, %8 : vector<16x64xf32>
    %cst_6 = arith.constant 5.000000e-01 : f32
    %10 = vector.broadcast %cst_6 : f32 to vector<16x64xf32>
    %11 = arith.mulf %10, %9 : vector<16x64xf32>
    %cst_7 = arith.constant 0.707106769 : f32
    %12 = vector.broadcast %cst_7 : f32 to vector<16x64xf32>
    %13 = arith.mulf %9, %12 : vector<16x64xf32>
    %14 = math.absf %13 : vector<16x64xf32>
    %cst_8 = arith.constant 0.327591091 : f32
    %15 = vector.broadcast %cst_8 : f32 to vector<16x64xf32>
    %16 = arith.mulf %15, %14 : vector<16x64xf32>
    %cst_9 = arith.constant 1.000000e+00 : f32
    %17 = vector.broadcast %cst_9 : f32 to vector<16x64xf32>
    %18 = arith.addf %17, %16 : vector<16x64xf32>
    %19 = tpu.reciprocal %18 {approx = true} : vector<16x64xf32> -> vector<16x64xf32>
    %cst_10 = arith.constant 1.06140542 : f32
    %20 = vector.broadcast %cst_10 : f32 to vector<16x64xf32>
    %21 = arith.mulf %20, %19 : vector<16x64xf32>
    %cst_11 = arith.constant -1.45315206 : f32
    %22 = vector.broadcast %cst_11 : f32 to vector<16x64xf32>
    %23 = arith.addf %21, %22 : vector<16x64xf32>
    %24 = arith.mulf %23, %19 : vector<16x64xf32>
    %cst_12 = arith.constant 1.42141378 : f32
    %25 = vector.broadcast %cst_12 : f32 to vector<16x64xf32>
    %26 = arith.addf %24, %25 : vector<16x64xf32>
    %27 = arith.mulf %26, %19 : vector<16x64xf32>
    %cst_13 = arith.constant -0.284496725 : f32
    %28 = vector.broadcast %cst_13 : f32 to vector<16x64xf32>
    %29 = arith.addf %27, %28 : vector<16x64xf32>
    %30 = arith.mulf %29, %19 : vector<16x64xf32>
    %cst_14 = arith.constant 0.254829586 : f32
    %31 = vector.broadcast %cst_14 : f32 to vector<16x64xf32>
    %32 = arith.addf %30, %31 : vector<16x64xf32>
    %33 = arith.mulf %32, %19 : vector<16x64xf32>
    %cst_15 = arith.constant 0.000000e+00 : f32
    %34 = vector.broadcast %cst_15 : f32 to vector<16x64xf32>
    %35 = arith.subf %34, %14 : vector<16x64xf32>
    %36 = arith.mulf %35, %14 : vector<16x64xf32>
    %37 = math.exp %36 : vector<16x64xf32>
    %38 = arith.mulf %33, %37 : vector<16x64xf32>
    %cst_16 = arith.constant 1.000000e+00 : f32
    %39 = vector.broadcast %cst_16 : f32 to vector<16x64xf32>
    %40 = arith.subf %39, %38 : vector<16x64xf32>
    %cst_17 = arith.constant 0.000000e+00 : f32
    %41 = vector.broadcast %cst_17 : f32 to vector<16x64xf32>
    %42 = arith.cmpf oge, %13, %41 : vector<16x64xf32>
    %cst_18 = arith.constant 0.000000e+00 : f32
    %43 = vector.broadcast %cst_18 : f32 to vector<16x64xf32>
    %44 = arith.subf %43, %40 : vector<16x64xf32>
    %45 = arith.select %42, %40, %44 : vector<16x64xi1>, vector<16x64xf32>
    %cst_19 = arith.constant 1.000000e+00 : f32
    %46 = vector.broadcast %cst_19 : f32 to vector<16x64xf32>
    %47 = arith.addf %46, %45 : vector<16x64xf32>
    %48 = arith.mulf %11, %47 : vector<16x64xf32>
    %c0_20 = arith.constant 0 : index
    %c0_21 = arith.constant 0 : index
    %49 = vector.load %arg15[%c0_20, %c0_21] : memref<16x32xf32, #tpu.memory_space<vmem>>, vector<16x32xf32>
    %50 = arith.truncf %48 : vector<16x64xf32> to vector<16x64xbf16>
    %c0_22 = arith.constant 0 : index
    %c0_23 = arith.constant 0 : index
    %51 = vector.load %arg10[%c0_22, %c0_23] : memref<64x32xbf16, #tpu.memory_space<vmem>>, vector<64x32xbf16>
    %cst_24 = arith.constant dense<0.000000e+00> : vector<16x32xf32>
    %52 = tpu.matmul %50, %51, %cst_24 {dimension_numbers = #tpu.dot_dimension_numbers<[1], [0], [0], [1], [0, 0, 1, 1], [], []>} : vector<16x64xbf16>, vector<64x32xbf16>, vector<16x32xf32> -> vector<16x32xf32>
    %53 = arith.addf %49, %52 : vector<16x32xf32>
    %c0_25 = arith.constant 0 : index
    %c0_26 = arith.constant 0 : index
    %54 = vector.load %arg15[%c0_25, %c0_26] : memref<16x32xf32, #tpu.memory_space<vmem>>, vector<16x32xf32>
    tpu.vector_store %arg15[%c0_25, %c0_26], %53 {strides = array<i32>} : memref<16x32xf32, #tpu.memory_space<vmem>>, vector<16x32xf32>,
    %c0_i32_27 = arith.constant 0 : i32
    %55 = arith.cmpi eq, %arg1, %c0_i32_27 : i32
    %56 = arith.extui %55 : i1 to i32
    %c0_i32_28 = arith.constant 0 : i32
    %57 = arith.cmpi ne, %56, %c0_i32_28 : i32
    scf.if %57 {
      %c0_29 = arith.constant 0 : index
      %c0_30 = arith.constant 0 : index
      %58 = vector.load %arg13[%c0_29, %c0_30] : memref<16x32xf32, #tpu.memory_space<vmem>>, vector<16x32xf32>
      %c0_31 = arith.constant 0 : index
      %c0_32 = arith.constant 0 : index
      %59 = vector.load %arg15[%c0_31, %c0_32] : memref<16x32xf32, #tpu.memory_space<vmem>>, vector<16x32xf32>
      %60 = arith.addf %58, %59 : vector<16x32xf32>
      %c0_33 = arith.constant 0 : index
      %c0_34 = arith.constant 0 : index
      %61 = vector.load %arg11[%c0_33, %c0_34] : memref<1x32xf32, #tpu.memory_space<vmem>>, vector<1x32xf32>
      %62 = vector.broadcast %61 : vector<1x32xf32> to vector<16x32xf32>
      %63 = arith.addf %60, %62 : vector<16x32xf32>
      %c0_35 = arith.constant 0 : index
      %c0_36 = arith.constant 0 : index
      %64 = vector.load %arg12[%c0_35, %c0_36] : memref<16x32xf32, #tpu.memory_space<vmem>>, vector<16x32xf32>
      tpu.vector_store %arg12[%c0_35, %c0_36], %63 {strides = array<i32>} : memref<16x32xf32, #tpu.memory_space<vmem>>, vector<16x32xf32>,
    } else {
    }
    return
  }
  func.func @transform_0(%arg0: i32, %arg1: i32) -> (i32, i32) {
    %c0_i32 = arith.constant 0 : i32
    %c0_i32_0 = arith.constant 0 : i32
    return %arg0, %c0_i32 : i32, i32
  }
  func.func @transform_1(%arg0: i32, %arg1: i32) -> (i32, i32) {
    %c0_i32 = arith.constant 0 : i32
    %c0_i32_0 = arith.constant 0 : i32
    return %arg0, %c0_i32 : i32, i32
  }
  func.func @transform_2(%arg0: i32, %arg1: i32) -> (i32, i32) {
    %c0_i32 = arith.constant 0 : i32
    %c0_i32_0 = arith.constant 0 : i32
    %c0_i32_1 = arith.constant 0 : i32
    return %c0_i32, %c0_i32_0 : i32, i32
  }
  func.func @transform_3(%arg0: i32, %arg1: i32) -> (i32, i32) {
    %c0_i32 = arith.constant 0 : i32
    %c0_i32_0 = arith.constant 0 : i32
    %c0_i32_1 = arith.constant 0 : i32
    return %c0_i32, %c0_i32_0 : i32, i32
  }
  func.func @transform_4(%arg0: i32, %arg1: i32) -> (i32, i32) {
    %c0_i32 = arith.constant 0 : i32
    %c0_i32_0 = arith.constant 0 : i32
    %c0_i32_1 = arith.constant 0 : i32
    return %c0_i32, %c0_i32_0 : i32, i32
  }
  func.func @transform_5(%arg0: i32, %arg1: i32) -> (i32, i32) {
    %c0_i32 = arith.constant 0 : i32
    %c0_i32_0 = arith.constant 0 : i32
    %c0_i32_1 = arith.constant 0 : i32
    return %c0_i32, %c0_i32_0 : i32, i32
  }
  func.func @transform_6(%arg0: i32, %arg1: i32) -> (i32, i32) {
    %c0_i32 = arith.constant 0 : i32
    %c0_i32_0 = arith.constant 0 : i32
    return %c0_i32, %arg1 : i32, i32
  }
  func.func @transform_7(%arg0: i32, %arg1: i32) -> (i32, i32) {
    %c0_i32 = arith.constant 0 : i32
    %c0_i32_0 = arith.constant 0 : i32
    return %c0_i32, %arg1 : i32, i32
  }
  func.func @transform_8(%arg0: i32, %arg1: i32) -> (i32, i32) {
    %c0_i32 = arith.constant 0 : i32
    %c0_i32_0 = arith.constant 0 : i32
    return %arg1, %c0_i32 : i32, i32
  }
  func.func @transform_9(%arg0: i32, %arg1: i32) -> (i32, i32) {
    %c0_i32 = arith.constant 0 : i32
    %c0_i32_0 = arith.constant 0 : i32
    %c0_i32_1 = arith.constant 0 : i32
    return %c0_i32, %c0_i32_0 : i32, i32
  }
  func.func @transform_10(%arg0: i32, %arg1: i32) -> (i32, i32) {
    %c0_i32 = arith.constant 0 : i32
    %c0_i32_0 = arith.constant 0 : i32
    return %arg0, %c0_i32 : i32, i32
  }
}

</mosaic_0001>

<bundles_post_ra>
// kernel: transformer_layer.4
= control target key start
LH: loop header
LB: loop body
LE: loop exit
PB: predicated region body
PF: predicated region fallthrough
CT: control target
= control target key end

     0   :  { %s875_s12 = smov 0   ;;  %s877_s13 = smov 0   ;;  %s965_s0 = inlined_call_operand.vmem [shape: bf16[2,2,16,8], index: 0, kind: input, shape index: {}]   ;;  %s966_s1 = inlined_call_operand.vmem [shape: bf16[2,2,8,8], index: 1, kind: input, shape index: {}]   ;;  %s967_s2 = inlined_call_operand.vmem [shape: bf16[2,2,8,8], index: 2, kind: input, shape index: {}]   ;;  %s968_s3 = inlined_call_operand.vmem [shape: bf16[2,2,16,8], index: 3, kind: output, shape index: {}]  }
   0x1   :  { %s879_s14 = smov 0   ;;  %s881_s15 = smov 0  }
   0x2   :  { %s883_s16 = smov 0  }
   0x3 LB: > { %s35_s17 = sadd.s32 1, %s841_s14  ;;  %s39_s18 = sadd.s32 1, %s845_s15  ;;  %s849_s16 = sphi %s883_s16, %s13_s16   ;;  %s845_s15 = sphi %s881_s15, %s972_s15   ;;  %s841_s14 = sphi %s879_s14, %s971_s14   ;;  %s837_s13 = sphi %s877_s13, %s970_s13   ;;  %s833_s12 = sphi %s875_s12, %s969_s12  }
   0x4   : > { %p37_p0 = scmp.ge.s32.totalorder %s35_s17, 2  ;;  %p716_p1 = scmp.ge.s32.totalorder %s849_s16, 1 }
   0x5   : > { %p220_p2 = scmp.lt.s32.totalorder %s849_s16, 5 }
   0x6   : > { %s974_s17 = smov (%p37_p0, %s35_s17), 0  ;;  %s976_s18 = smov (!%p37_p0, %s39_s18), %s845_s15 }
   0x7   : > { %p221_p3 = pnand %p716_p1, %p220_p2  ;;  %p41_p4 = scmp.ge.s32.totalorder %s976_s18, 2 }
   0x8   : > { %p283_p5 = scmp.lt.s32.totalorder (!%p221_p3), %s837_s13, 1  ;;  %p285_p6 = scmp.lt.s32.totalorder (!%p221_p3), %s833_s12, 1 }
   0x9   : > { %s978_s18 = smov (%p41_p4, %s976_s18), 0  ;;  %224 = sbr.rel (%p221_p3) target bundleno = 802 (0x322), region = 32 }
   0xe   : > { %vm342_vm0 = vcmask 64512   ;;  %v851_v0 = vmov 0.0   ;;  %vm852_vm1 = vmmov 0   ;;  %s980_s13 = smov (!%p283_p5, %s837_s13), 1  ;;  %s982_s12 = smov (!%p285_p6, %s833_s12), 1  ;;  %vm337_vm2 = vcmask 7168  }
   0xf   : > { %740 = vmatprep.subr.bf16.mxu0 %v851_v0  ;;  %343 = vst.msk [vmem:[#allocation4] sm:$0xff] %vm342_vm0, %v851_v0  ;;  %344 = vst.msk [vmem:[#allocation4 + $0x8] sm:$0xff] %vm342_vm0, %v851_v0  ;;  %742 = vmatprep.mubr.msk.bf16.mxu0 %vm852_vm1, %v851_v0  ;;  %s718_s19 = sshll.u32 %s980_s13, 2  ;;  %s720_s20 = sshll.u32 %s980_s13, 1  ;;  %v853_v4 = vmov -inf   ;;  %v854_v13 = vmov 0  }
  0x10   : > { %746 = vmatprep.subr.bf16.mxu1 %v851_v0  ;;  %748 = vmatprep.mubr.msk.bf16.mxu1 %vm852_vm1, %v851_v0  ;;  %s717_s21 = sshll.u32 %s982_s12, 1  ;;  %s907_s22 = sadd.s32 %s720_s20, %s982_s12  ;;  %338 = vst.msk [vmem:[#allocation2] sm:$0xff] %vm337_vm2, %v853_v4  ;;  %339 = vst.msk [vmem:[#allocation2 + $0x8] sm:$0xff] %vm337_vm2, %v853_v4  ;;  %vm469_vm3 = vcmask 1043456   ;;  %vm549_vm4 = vcmask 60416  }
  0x11   : > { %s909_s23 = sadd.s32 %s718_s19, %s717_s21  ;;  %s721_s24 = sshll.u32 %s907_s22, 2  ;;  %340 = vst.msk [vmem:[#allocation3] sm:$0xff] %vm337_vm2, %v851_v0  ;;  %341 = vst.msk [vmem:[#allocation3 + $0x8] sm:$0xff] %vm337_vm2, %v851_v0  ;;  %796 = vset.pattern.permute.xlu1 %v854_v13  ;;  %797 = vset.pattern.permute.xlu0 %v854_v13 }
  0x12   : > { %s719_s25 = sshll.u32 %s909_s23, 2  ;;  %s306_s28 = scalar_lea.vmem %s966_s1, %s721_s24 }
  0x13   : > { %s294_s4 = scalar_lea.vmem %s965_s0, %s719_s25  ;;  %v347_v1 = vld [vmem:[%s306_s28] sm:$0xf]  ;;  %s317_s7 = scalar_lea.vmem %s967_s2, %s721_s24 }
  0x14   : > { %v359_v2 = vsel %vm342_vm0, %v347_v1, 0  ;;  %v798_v3 = vld [vmem:[%s294_s4] sm:$0xff]   ;;  %s330_s10 = scalar_lea.vmem %s968_s3, %s719_s25 }
  0x15   : > { %741 = vmatpush3.bf16.xpose.msra.mxu0 %v359_v2  ;;  %v348_v22 = vld [vmem:[%s317_s7] sm:$0xf] }
  0x16   : > { %v471_v23 = vsel %vm469_vm3, %v348_v22, 0  ;;  %v451_v51 = vld [vmem:[#allocation4] sm:$0xff]  ;;  %v452_v54 = vld [vmem:[#allocation4 + $0x8] sm:$0xff] }
  0x17   : > { %v404_v14 = vld [vmem:[#allocation2] sm:$0xff]  ;;  %v405_v17 = vld [vmem:[#allocation2 + $0x8] sm:$0xff]  ;;  %747 = vmatpush3.bf16.msra.mxu1 %v471_v23 }
  0x18   : > { %v436_v39 = vld [vmem:[#allocation3] sm:$0xff]  ;;  %v437_v42 = vld [vmem:[#allocation3 + $0x8] sm:$0xff] }
  0x1c   : > { %743 = vmatmul.mubr.msk.bf16.vlgmr.msra.gmra.mxu0 %vm342_vm0, %v798_v3 }
  0xdc   : > { %v395_v5 = vpop.f32.mrf.mxu0 }
  0xdd   : > { %v402_v6 = vmul.f32 0.35355338, %v395_v5 }
  0xde   : > { %v744_v7 = vpop.f32.mrf.mxu0 }
  0xdf   : > { %v406_v8 = vsel %vm342_vm0, %v402_v6, -inf }
  0xe0   : > { %407 = vmax.xlane.f32.xlu0 %v406_v8  ;;  %v398_v9 = vpop.f32.mrf.mxu0 }
  0xe1   : > { %v403_v10 = vmul.f32 0.35355338, %v398_v9 }
  0xe2   : > { %v745_v11 = vpop.f32.mrf.mxu0 }
  0xe3   : > { %v409_v12 = vsel %vm342_vm0, %v403_v10, -inf }
  0xe4   : > { %410 = vmax.xlane.f32.xlu0 %v409_v12 }
 0x169   : > { %v408_v15 = vpop.xlane.xlu0 %407 }
 0x16a   : > { %v412_v16 = vmax.f32 %v404_v14, %v408_v15 }
 0x16c   : > { %v414_v18 = vsub.f32 %v404_v14, %v412_v16  ;;  %518 = vst.msk [vmem:[#allocation2] sm:$0xff] %vm337_vm2, %v412_v16  ;;  %422 = vperm.xlu1 %796, %v412_v16  }
 0x16d   : > { %v411_v19 = vpop.xlane.xlu0 %410 }
 0x16e   : > { %v413_v20 = vmax.f32 %v405_v17, %v411_v19  ;;  %v416_v36 = vmul.f32 1.442695, %v414_v18 }
 0x170   : > { %v415_v21 = vsub.f32 %v405_v17, %v413_v20  ;;  %519 = vst.msk [vmem:[#allocation2 + $0x8] sm:$0xff] %vm337_vm2, %v413_v20  ;;  %427 = vperm.xlu1 %796, %v413_v20  }
 0x172   : > { %v418_v33 = vmul.f32 1.442695, %v415_v21 }
 0x1e7   : > { %v423_v24 = vpop.permute.xlu1 %422 }
 0x1e8   : > { %v430_v25 = vsub.f32 %v402_v6, %v423_v24 }
 0x1ea   : > { %v432_v26 = vmul.f32 1.442695, %v430_v25 }
 0x1eb   : > { %v428_v27 = vpop.permute.xlu1 %427 }
 0x1ec   : > { %799 = vpow2.f32 %v432_v26  ;;  %v431_v28 = vsub.f32 %v403_v10, %v428_v27 }
 0x1ee   : > { %v434_v29 = vmul.f32 1.442695, %v431_v28 }
 0x1f0   : > { %801 = vpow2.f32 %v434_v29 }
 0x1f1   : > { %803 = vpow2.f32 %v418_v33 }
 0x1f2   : > { %805 = vpow2.f32 %v416_v36 }
 0x1f9   : > { %v800_v30 = vpop.eup %799 }
 0x1fa   : > { %v440_v31 = vsel %vm342_vm0, %v800_v30, 0.0 }
 0x1fb   : > { %441 = vadd.xlane.f32.xlu0 %v440_v31 }
 0x1fd   : > { %v802_v32 = vpop.eup %801 }
 0x1fe   : > { %v443_v34 = vsel %vm342_vm0, %v802_v32, 0.0  ;;  %v465_v35 = vpack.c.bf16 %v802_v32, %v800_v30  ;;  %v804_v37 = vpop.eup %803 }
 0x1ff   : > { %444 = vadd.xlane.f32.xlu1 %v443_v34  ;;  %v806_v38 = vpop.eup %805  ;;  %v439_v44 = vmul.f32 %v804_v37, %v437_v42 }
 0x200   : > { %749 = vmatmul.mubr.msk.bf16.vlgmr.msra.gmra.mxu1 %vm342_vm0, %v465_v35  ;;  %v438_v40 = vmul.f32 %v806_v38, %v436_v39 }
 0x210   : > { %460 = vperm.xlu1 %796, %v804_v37  }
 0x211   : > { %455 = vperm.xlu0 %797, %v806_v38  }
 0x284   : > { %v442_v41 = vpop.xlane.xlu0 %441 }
 0x285   : > { %v446_v43 = vadd.f32 %v442_v41, %v438_v40 }
 0x287   : > { %449 = vst.msk [vmem:[#allocation3] sm:$0xff] %vm337_vm2, %v446_v43 }
 0x288   : > { %v445_v45 = vpop.xlane.xlu1 %444 }
 0x289   : > { %v447_v46 = vadd.f32 %v445_v45, %v439_v44 }
 0x28b   : > { %450 = vst.msk [vmem:[#allocation3 + $0x8] sm:$0xff] %vm337_vm2, %v447_v46 }
 0x28c   : > { %v456_v52 = vpop.permute.xlu0 %455  ;;  %v461_v55 = vpop.permute.xlu1 %460 }
 0x28d   : > { %v463_v53 = vmul.f32 %v456_v52, %v451_v51  ;;  %v464_v59 = vmul.f32 %v461_v55, %v452_v54 }
 0x28e   : > { %v525_v47 = vld [vmem:[#allocation3] sm:$0xff] }
 0x28f   : > { %807 = vrcp.f32 %v525_v47 }
 0x292   : > { %v526_v48 = vld [vmem:[#allocation3 + $0x8] sm:$0xff] }
 0x293   : > { %809 = vrcp.f32 %v526_v48 }
 0x29c   : > { %v808_v49 = vpop.eup %807 }
 0x29d   : > { %531 = vperm.xlu0 %797, %v808_v49  }
 0x2a0   : > { %v810_v50 = vpop.eup %809 }
 0x2a1   : > { %536 = vperm.xlu0 %797, %v810_v50  }
 0x2c0   : > { %v507_v56 = vpop.f32.mrf.mxu1 }
 0x2c1   : > { %v514_v57 = vadd.f32 %v507_v56, %v463_v53 }
 0x2c2   : > { %v750_v58 = vpop.f32.mrf.mxu1 }
 0x2c3   : > { %516 = vst.msk [vmem:[#allocation4] sm:$0xff] %vm342_vm0, %v514_v57 }
 0x2c4   : > { %v510_v60 = vpop.f32.mrf.mxu1 }
 0x2c5   : > { %v515_v61 = vadd.f32 %v510_v60, %v464_v59 }
 0x2c6   : > { %v751_v62 = vpop.f32.mrf.mxu1 }
 0x2c7   : > { %517 = vst.msk [vmem:[#allocation4 + $0x8] sm:$0xff] %vm342_vm0, %v515_v61 }
 0x2ca   : > { %v523_v63 = vld [vmem:[#allocation4] sm:$0xff] }
 0x2ce   : > { %v524_v3 = vld [vmem:[#allocation4 + $0x8] sm:$0xff] }
 0x318   : > { %v532_v0 = vpop.permute.xlu0 %531 }
 0x319   : > { %v539_v1 = vmul.f32 %v532_v0, %v523_v63 }
 0x31b   : > { %v734_v2 = vpack.c.bf16 %v539_v1, %v539_v1 }
 0x31c   : > { %v537_v4 = vpop.permute.xlu0 %536 }
 0x31d   : > { %550 = vst.msk [vmem:[%s330_s10] sm:$0xf] %vm549_vm4, %v734_v2  ;;  %v540_v5 = vmul.f32 %v537_v4, %v524_v3 }
 0x31f   : > { %v735_v6 = vpack.c.bf16 %v540_v5, %v540_v5 }
 0x321   : > { %551 = vst.msk [vmem:[%s330_s10 + $0x4] sm:$0xf] %vm549_vm4, %v735_v6 }
 0x322 PF: > { %s13_s16 = sadd.s32 1, %s849_s16   ;;  %s969_s12 = smov %s841_s14 }
 0x323   : > { %p10_p7 = scmp.ge.s32.totalorder %s13_s16, 6   ;;  %s970_s13 = smov %s845_s15 }
 0x324   : > { %s971_s14 = smov %s974_s17  ;;  %s972_s15 = smov %s978_s18 }
 0x325   :  { %12 = sbr.rel (!%p10_p7) target bundleno = 3 (0x3), region = 76 }

// kernel: transformer_layer.3
= control target key start
LH: loop header
LB: loop body
LE: loop exit
PB: predicated region body
PF: predicated region fallthrough
CT: control target
= control target key end

     0   :  { %vm28_vm0 = vcmask 261120   ;;  %v211_v14 = vmov 0.0   ;;  %vm212_vm1 = vmmov 0   ;;  %vm148_vm2 = vcmask 257024   ;;  %s214_s14 = smov 96   ;;  %s299_s0 = inlined_call_operand.vmem [shape: f32[16,32], index: 0, kind: input, shape index: {}]   ;;  %s300_s3 = inlined_call_operand.vmem [shape: bf16[32,64], index: 3, kind: input, shape index: {}]   ;;  %s301_s1 = inlined_call_operand.vmem [shape: f32[1,32], index: 1, kind: input, shape index: {}]   ;;  %s302_s2 = inlined_call_operand.vmem [shape: f32[1,32], index: 2, kind: input, shape index: {}]   ;;  %s303_s4 = inlined_call_operand.vmem [shape: f32[1,64], index: 4, kind: input, shape index: {}]   ;;  %s304_s5 = inlined_call_operand.vmem [shape: bf16[16,32], index: 5, kind: output, shape index: {0}]   ;;  %s305_s7 = inlined_call_operand.vmem [shape: bf16[16,16], index: 7, kind: output, shape index: {2}]   ;;  %s306_s6 = inlined_call_operand.vmem [shape: bf16[16,16], index: 6, kind: output, shape index: {1}]  }
   0x1   :  { %v24_v0 = vld [vmem:[%s299_s0] sm:$0xff]  ;;  %v25_v1 = vld [vmem:[%s299_s0 + $0x8] sm:$0xff]  ;;  %193 = vmatprep.subr.bf16.mxu0 %v211_v14  ;;  %197 = vmatprep.mubr.msk.bf16.mxu0 %vm212_vm1, %v211_v14  ;;  %vm157_vm3 = vcmask 125952  }
   0x2   :  { %v29_v2 = vsel %vm28_vm0, %v24_v0, 0.0  ;;  %v32_v3 = vsel %vm28_vm0, %v25_v1, 0.0  ;;  %v205_v15 = vld [vmem:[%s300_s3 + $0x8] sm:$0xff]   ;;  %v206_v16 = vld [vmem:[%s300_s3] sm:$0xff]  }
   0x3   :  { %30 = vadd.xlane.f32.xlu0 %v29_v2  ;;  %194 = vmatpush3.bf16.msra.mxu0 %v205_v15  ;;  %v180_v25 = vld [vmem:[%s301_s1] ss:$0 sm:$0xff] }
   0x4   :  { %195 = vmatprep.subr.bf16.mxu0 %v211_v14  ;;  %v181_v29 = vld [vmem:[%s302_s2] ss:$0 sm:$0xff]  ;;  %s213_s2 = smov 80  }
   0x5   :  { %v182_v34 = vld [vmem:[%s303_s4] ss:$0 sm:$0xff] }
   0x7   :  { %33 = vadd.xlane.f32.xlu0 %v32_v3  ;;  %196 = vmatpush3.bf16.msra.mxu0 %v206_v16 }
  0x8c   :  { %v31_v4 = vpop.xlane.xlu0 %30 }
  0x8d   :  { %v36_v5 = vmul.f32 0.03125, %v31_v4 }
  0x8f   :  { %v38_v6 = vsub.f32 %v24_v0, %v36_v5 }
  0x90   :  { %v34_v7 = vpop.xlane.xlu0 %33 }
  0x91   :  { %v37_v8 = vmul.f32 0.03125, %v34_v7  ;;  %v40_v9 = vmul.f32 %v38_v6, %v38_v6 }
  0x93   :  { %v39_v10 = vsub.f32 %v25_v1, %v37_v8  ;;  %v42_v11 = vsel %vm28_vm0, %v40_v9, 0.0 }
  0x94   :  { %43 = vadd.xlane.f32.xlu1 %v42_v11 }
  0x95   :  { %v41_v12 = vmul.f32 %v39_v10, %v39_v10 }
  0x97   :  { %v45_v13 = vsel %vm28_vm0, %v41_v12, 0.0 }
  0x98   :  { %46 = vadd.xlane.f32.xlu1 %v45_v13 }
 0x11d   :  { %v44_v17 = vpop.xlane.xlu1 %43 }
 0x11e   :  { %v48_v18 = vmul.f32 0.03125, %v44_v17 }
 0x120   :  { %v50_v19 = vadd.f32 1e-05, %v48_v18 }
 0x121   :  { %v47_v20 = vpop.xlane.xlu1 %46 }
 0x122   :  { %207 = vrsqrt.f32 %v50_v19  ;;  %v49_v21 = vmul.f32 0.03125, %v47_v20 }
 0x124   :  { %v51_v22 = vadd.f32 1e-05, %v49_v21 }
 0x126   :  { %209 = vrsqrt.f32 %v51_v22 }
 0x12f   :  { %v208_v23 = vpop.eup %207 }
 0x130   :  { %v54_v24 = vmul.f32 %v208_v23, %v38_v6 }
 0x132   :  { %v62_v28 = vmul.f32 %v180_v25, %v54_v24 }
 0x133   :  { %v210_v26 = vpop.eup %209 }
 0x134   :  { %v55_v27 = vmul.f32 %v210_v26, %v39_v10  ;;  %v70_v31 = vadd.f32 %v181_v29, %v62_v28 }
 0x136   :  { %v63_v30 = vmul.f32 %v180_v25, %v55_v27 }
 0x138   :  { %v71_v32 = vadd.f32 %v181_v29, %v63_v30 }
 0x13a   :  { %v72_v33 = vpack.c.bf16 %v71_v32, %v70_v31 }
 0x13c   :  { %198 = vmatmul.mubr.msk.bf16.vlgmr.msra.gmra.mxu0 %vm28_vm0, %v72_v33 }
 0x1fc   :  { %v133_v35 = vpop.f32.mrf.mxu0 }
 0x1fd   :  { %v134_v36 = vadd.f32 %v182_v34, %v133_v35 }
 0x1fe   :  { %v199_v37 = vpop.f32.mrf.mxu0 }
 0x1ff   :  { %v188_v38 = vpack.c.bf16 %v134_v36, %v134_v36 }
 0x200   :  { %v136_v39 = vpop.f32.mrf.mxu0 }
 0x201   :  { %149 = vst.msk [vmem:[%s304_s5] sm:$0xf] %vm148_vm2, %v188_v38  ;;  %v137_v40 = vadd.f32 %v182_v34, %v136_v39  ;;  %160 = vrot.lane.b32.xlu1 %v188_v38, %s213_s2  ;;  %151 = vrot.lane.b32.xlu0 %v188_v38, %s214_s14 }
 0x202   :  { %v200_v41 = vpop.f32.mrf.mxu0 }
 0x203   :  { %v189_v42 = vpack.c.bf16 %v137_v40, %v137_v40 }
 0x205   :  { %150 = vst.msk [vmem:[%s304_s5 + $0x4] sm:$0xf] %vm148_vm2, %v189_v42  ;;  %153 = vrot.lane.b32.xlu1 %v189_v42, %s214_s14 }
 0x209   :  { %162 = vrot.lane.b32.xlu1 %v189_v42, %s213_s2 }
 0x273   :  { %v161_v43 = vpop.permute.xlu1 %160  ;;  %v152_v44 = vpop.permute.xlu0 %151 }
 0x274   :  { %166 = vst.msk [vmem:[%s305_s7] sm:$0xf] %vm157_vm3, %v161_v43  ;;  %158 = vst.msk [vmem:[%s306_s6] sm:$0xf] %vm157_vm3, %v152_v44 }
 0x277   :  { %v154_v45 = vpop.permute.xlu1 %153 }
 0x278   :  { %159 = vst.msk [vmem:[%s306_s6 + $0x4] sm:$0xf] %vm157_vm3, %v154_v45 }
 0x27b   :  { %v163_v46 = vpop.permute.xlu1 %162 }
 0x27c   :  { %167 = vst.msk [vmem:[%s305_s7 + $0x4] sm:$0xf] %vm157_vm3, %v163_v46 }

// kernel: transformer_layer.5
= control target key start
LH: loop header
LB: loop body
LE: loop exit
PB: predicated region body
PF: predicated region fallthrough
CT: control target
= control target key end

     0   :  { %v518_v1 = vmov 0.0   ;;  %vm519_vm0 = vmmov 0   ;;  %vm71_vm1 = vcmask 261120   ;;  %s658_s0 = inlined_call_operand.vmem [shape: f32[16,32], index: 0, kind: input, shape index: {}]   ;;  %s659_s1 = inlined_call_operand.vmem [shape: bf16[16,32], index: 1, kind: input, shape index: {}]   ;;  %s660_s2 = inlined_call_operand.vmem [shape: bf16[32,32], index: 2, kind: input, shape index: {}]   ;;  %s661_s3 = inlined_call_operand.vmem [shape: f32[1,32], index: 3, kind: input, shape index: {}]   ;;  %s662_s4 = inlined_call_operand.vmem [shape: f32[1,32], index: 4, kind: input, shape index: {}]   ;;  %s663_s5 = inlined_call_operand.vmem [shape: f32[1,32], index: 5, kind: input, shape index: {}]   ;;  %s664_s6 = inlined_call_operand.vmem [shape: bf16[32,64], index: 6, kind: input, shape index: {}]   ;;  %s665_s7 = inlined_call_operand.vmem [shape: f32[1,64], index: 7, kind: input, shape index: {}]   ;;  %s666_s8 = inlined_call_operand.vmem [shape: bf16[64,32], index: 8, kind: input, shape index: {}]   ;;  %s667_s9 = inlined_call_operand.vmem [shape: f32[1,32], index: 9, kind: input, shape index: {}]   ;;  %s668_s10 = inlined_call_operand.hbm [shape: f32[16,32], index: 10, kind: output, shape index: {}]  }
   0x1   :  { %v475_v0 = vld [vmem:[%s660_s2 + $0x8] sm:$0xff]   ;;  %442 = vmatprep.subr.bf16.mxu1 %v518_v1  ;;  %458 = vmatprep.subr.bf16.mxu0 %v518_v1  ;;  %v476_v2 = vld [vmem:[%s660_s2] sm:$0xff]   ;;  %169 = vst.msk [vmem:[#allocation4] sm:$0xff] %vm71_vm1, %v518_v1  ;;  %170 = vst.msk [vmem:[#allocation4 + $0x8] sm:$0xff] %vm71_vm1, %v518_v1 }
   0x2   :  { %443 = vmatpush3.bf16.msra.mxu1 %v475_v0  ;;  %446 = vmatprep.mubr.msk.bf16.mxu1 %vm519_vm0, %v518_v1  ;;  %v477_v3 = vld [vmem:[%s659_s1] sm:$0xff]  }
   0x3   :  { %444 = vmatprep.subr.bf16.mxu1 %v518_v1  ;;  %466 = vmatprep.mubr.msk.bf16.mxu0 %vm519_vm0, %v518_v1 }
   0x6   :  { %445 = vmatpush3.bf16.msra.mxu1 %v476_v2 }
   0x7   :  { %450 = vmatprep.subr.bf16.mxu1 %v518_v1 }
   0x8   :  { %15 = vsyncpa [#allocation6], 0  ;;  %v414_v4 = vld [vmem:[%s661_s3] ss:$0 sm:$0xff]  ;;  %v117_v11 = vld [vmem:[%s658_s0 + $0x8] sm:$0xff]  ;;  %vm329_vm4 = vcmask 523264  }
   0x9   :  { %447 = vmatmul.mubr.msk.bf16.vlgmr.msra.gmra.mxu1 %vm71_vm1, %v477_v3  ;;  %v116_v6 = vld [vmem:[%s658_s0] sm:$0xff]  ;;  %v478_v27 = vld [vmem:[%s664_s6 + $0x8] sm:$0xff]   ;;  %v480_v48 = vld [vmem:[%s666_s8 + $0x18] sm:$0xff]   ;;  %s520_s16 = smov [#allocation5]  }
   0xa   :  { %454 = vmatprep.mubr.msk.bf16.mxu1 %vm519_vm0, %v518_v1  ;;  %451 = vmatpush3.bf16.msra.mxu1 %v478_v27  ;;  %v479_v28 = vld [vmem:[%s664_s6] sm:$0xff]   ;;  %v481_v49 = vld [vmem:[%s666_s8 + $0x10] sm:$0xff]   ;;  %v482_v50 = vld [vmem:[%s666_s8 + $0x8] sm:$0xff]   ;;  %s403_s17 = sshll.u32 %s520_s16, 4  ;;  %s404_s17 = int_to_ptr.vmem [resolvable:$true] %s403_s17 }
   0xb   :  { %452 = vmatprep.subr.bf16.mxu1 %v518_v1  ;;  %v419_v36 = vld [vmem:[%s662_s4] ss:$0 sm:$0xff]  ;;  %459 = vmatpush3.bf16.msra.mxu0 %v480_v48  ;;  %s496_s18 = scalar_lea.vmem %s404_s17, 256  ;;  %p501_p1 = scmp.lt.s32.totalorder %s404_s17, %s404_s17 }
   0xc   :  { %v420_v38 = vld [vmem:[%s663_s5] ss:$0 sm:$0xff]  ;;  %460 = vmatprep.subr.bf16.mxu0 %v518_v1  ;;  %p497_p0 = scmp.ne.s32.totalorder %s404_s17, %s496_s18  ;;  %p502_p2 = scmp.lt.s32.totalorder %s496_s18, %s496_s18 }
   0xd   :  { %v483_v51 = vld [vmem:[%s666_s8] sm:$0xff]  }
   0xe   :  { %453 = vmatpush3.bf16.msra.mxu1 %v479_v28  ;;  %v421_v52 = vld [vmem:[%s665_s7] ss:$0 sm:$0xff]  ;;  %p503_p3 = por %p502_p2, %p501_p1 }
   0xf   :  { %461 = vmatpush3.bf16.msra.mxu0 %v481_v49 }
  0x10   :  { %462 = vmatprep.subr.bf16.mxu0 %v518_v1  ;;  %p504_p4 = pnand %p503_p3, %p497_p0 }
  0x13   :  { %463 = vmatpush3.bf16.msra.mxu0 %v482_v50  ;;  %v295_v50 = vld [vmem:[#allocation4 + $0x8] sm:$0xff] }
  0x14   :  { %464 = vmatprep.subr.bf16.mxu0 %v518_v1 }
  0x17   :  { %465 = vmatpush3.bf16.msra.mxu0 %v483_v51 }
  0xc9   :  { %v109_v5 = vpop.f32.mrf.mxu1 }
  0xca   :  { %v110_v7 = vadd.f32 %v414_v4, %v109_v5 }
  0xcb   :  { %v448_v8 = vpop.f32.mrf.mxu1 }
  0xcc   :  { %v118_v9 = vadd.f32 %v116_v6, %v110_v7 }
  0xcd   :  { %v112_v10 = vpop.f32.mrf.mxu1 }
  0xce   :  { %120 = vst.msk [vmem:[#allocation2] sm:$0xff] %vm71_vm1, %v118_v9  ;;  %v113_v12 = vadd.f32 %v414_v4, %v112_v10  ;;  %v124_v13 = vsel %vm71_vm1, %v118_v9, 0.0 }
  0xcf   :  { %125 = vadd.xlane.f32.xlu0 %v124_v13  ;;  %v449_v14 = vpop.f32.mrf.mxu1 }
  0xd0   :  { %v119_v15 = vadd.f32 %v117_v11, %v113_v12 }
  0xd2   :  { %121 = vst.msk [vmem:[#allocation2 + $0x8] sm:$0xff] %vm71_vm1, %v119_v15  ;;  %v127_v16 = vsel %vm71_vm1, %v119_v15, 0.0 }
  0xd3   :  { %128 = vadd.xlane.f32.xlu0 %v127_v16 }
 0x158   :  { %v126_v17 = vpop.xlane.xlu0 %125 }
 0x159   :  { %v131_v18 = vmul.f32 0.03125, %v126_v17 }
 0x15b   :  { %v133_v19 = vsub.f32 %v118_v9, %v131_v18 }
 0x15c   :  { %v129_v20 = vpop.xlane.xlu0 %128 }
 0x15d   :  { %v132_v21 = vmul.f32 0.03125, %v129_v20  ;;  %v135_v22 = vmul.f32 %v133_v19, %v133_v19 }
 0x15f   :  { %v134_v23 = vsub.f32 %v119_v15, %v132_v21  ;;  %v137_v24 = vsel %vm71_vm1, %v135_v22, 0.0 }
 0x160   :  { %138 = vadd.xlane.f32.xlu1 %v137_v24 }
 0x161   :  { %v136_v25 = vmul.f32 %v134_v23, %v134_v23 }
 0x163   :  { %v140_v26 = vsel %vm71_vm1, %v136_v25, 0.0 }
 0x164   :  { %141 = vadd.xlane.f32.xlu1 %v140_v26 }
 0x1e9   :  { %v139_v29 = vpop.xlane.xlu1 %138 }
 0x1ea   :  { %v143_v30 = vmul.f32 0.03125, %v139_v29 }
 0x1ec   :  { %v145_v31 = vadd.f32 1e-05, %v143_v30 }
 0x1ed   :  { %v142_v32 = vpop.xlane.xlu1 %141 }
 0x1ee   :  { %484 = vrsqrt.f32 %v145_v31  ;;  %v144_v33 = vmul.f32 0.03125, %v142_v32 }
 0x1f0   :  { %v146_v34 = vadd.f32 1e-05, %v144_v33 }
 0x1f2   :  { %486 = vrsqrt.f32 %v146_v34 }
 0x1fb   :  { %v485_v35 = vpop.eup %484 }
 0x1fc   :  { %v149_v37 = vmul.f32 %v485_v35, %v133_v19 }
 0x1fe   :  { %v157_v39 = vmul.f32 %v419_v36, %v149_v37 }
 0x1ff   :  { %v487_v40 = vpop.eup %486 }
 0x200   :  { %v165_v41 = vadd.f32 %v420_v38, %v157_v39  ;;  %v150_v42 = vmul.f32 %v487_v40, %v134_v23 }
 0x202   :  { %167 = vst.msk [vmem:[#allocation3] sm:$0xff] %vm71_vm1, %v165_v41  ;;  %v158_v43 = vmul.f32 %v419_v36, %v150_v42 }
 0x204   :  { %v166_v44 = vadd.f32 %v420_v38, %v158_v43 }
 0x206   :  { %168 = vst.msk [vmem:[#allocation3 + $0x8] sm:$0xff] %vm71_vm1, %v166_v44 }
 0x209   :  { %v171_v45 = vld [vmem:[#allocation3] sm:$0xff] }
 0x20d   :  { %v172_v46 = vld [vmem:[#allocation3 + $0x8] sm:$0xff] }
 0x20e   :  { %v173_v47 = vpack.c.bf16 %v172_v46, %v171_v45  ;;  %v294_v46 = vld [vmem:[#allocation4] sm:$0xff] }
 0x210   :  { %455 = vmatmul.mubr.msk.bf16.vlgmr.msra.gmra.mxu1 %vm71_vm1, %v173_v47 }
 0x2d0   :  { %v235_v53 = vpop.f32.mrf.mxu1 }
 0x2d1   :  { %v236_v54 = vadd.f32 %v421_v52, %v235_v53 }
 0x2d2   :  { %v456_v55 = vpop.f32.mrf.mxu1 }
 0x2d3   :  { %v244_v56 = vmul.f32 0.70710677, %v236_v54  ;;  %v242_v40 = vmul.f32 0.5, %v236_v54  ;;  %v381_v54 = vld [vmem:[#allocation2] sm:$0xff] }
 0x2d4   :  { %v238_v57 = vpop.f32.mrf.mxu1 }
 0x2d5   :  { %v246_v58 = vand.u32 2147483647, %v244_v56  ;;  %v239_v59 = vadd.f32 %v421_v52, %v238_v57  ;;  %vm284_vm2 = vcmp.ge.f32.partialorder %v244_v56, 0.0  ;;  %v430_v56 = vld [vmem:[%s667_s9] ss:$0 sm:$0xff] }
 0x2d6   :  { %v457_v60 = vpop.f32.mrf.mxu1 }
 0x2d7   :  { %v248_v61 = vmul.f32 0.3275911, %v246_v58  ;;  %v245_v62 = vmul.f32 0.70710677, %v239_v59  ;;  %v272_v3 = vsub.f32 0.0, %v246_v58  ;;  %v243_v41 = vmul.f32 0.5, %v239_v59 }
 0x2d8   :  { %v382_v59 = vld [vmem:[#allocation2 + $0x8] sm:$0xff] }
 0x2d9   :  { %v250_v63 = vadd.f32 1.0, %v248_v61  ;;  %v247_v0 = vand.u32 2147483647, %v245_v62  ;;  %v274_v4 = vmul.f32 %v272_v3, %v246_v58  ;;  %vm285_vm3 = vcmp.ge.f32.partialorder %v245_v62, 0.0 }
 0x2db   :  { %488 = vrcp.f32 %v250_v63  ;;  %v249_v1 = vmul.f32 0.3275911, %v247_v0  ;;  %v273_v5 = vsub.f32 0.0, %v247_v0  ;;  %v276_v8 = vmul.f32 1.442695, %v274_v4 }
 0x2dd   :  { %v251_v2 = vadd.f32 1.0, %v249_v1  ;;  %v275_v9 = vmul.f32 %v273_v5, %v247_v0 }
 0x2df   :  { %490 = vrcp.f32 %v251_v2  ;;  %v278_v14 = vmul.f32 1.442695, %v275_v9 }
 0x2e0   :  { %492 = vpow2.f32 %v276_v8 }
 0x2e1   :  { %494 = vpow2.f32 %v278_v14 }
 0x2e8   :  { %v489_v6 = vpop.eup %488 }
 0x2e9   :  { %v254_v7 = vmul.f32 1.0614054, %v489_v6 }
 0x2eb   :  { %v256_v10 = vadd.f32 -1.4531521, %v254_v7 }
 0x2ec   :  { %v491_v11 = vpop.eup %490 }
 0x2ed   :  { %v258_v12 = vmul.f32 %v489_v6, %v256_v10  ;;  %v255_v13 = vmul.f32 1.0614054, %v491_v11  ;;  %v493_v27 = vpop.eup %492 }
 0x2ee   :  { %v495_v32 = vpop.eup %494 }
 0x2ef   :  { %v260_v15 = vadd.f32 1.4214138, %v258_v12  ;;  %v257_v16 = vadd.f32 -1.4531521, %v255_v13 }
 0x2f1   :  { %v262_v17 = vmul.f32 %v489_v6, %v260_v15  ;;  %v259_v18 = vmul.f32 %v491_v11, %v257_v16 }
 0x2f3   :  { %v264_v19 = vadd.f32 -0.28449672, %v262_v17  ;;  %v261_v20 = vadd.f32 1.4214138, %v259_v18 }
 0x2f5   :  { %v266_v21 = vmul.f32 %v489_v6, %v264_v19  ;;  %v263_v22 = vmul.f32 %v491_v11, %v261_v20 }
 0x2f7   :  { %v268_v23 = vadd.f32 0.2548296, %v266_v21  ;;  %v265_v24 = vadd.f32 -0.28449672, %v263_v22 }
 0x2f9   :  { %v270_v25 = vmul.f32 %v489_v6, %v268_v23  ;;  %v267_v26 = vmul.f32 %v491_v11, %v265_v24 }
 0x2fb   :  { %v280_v28 = vmul.f32 %v493_v27, %v270_v25  ;;  %v269_v29 = vadd.f32 0.2548296, %v267_v26 }
 0x2fd   :  { %v282_v30 = vsub.f32 1.0, %v280_v28  ;;  %v271_v31 = vmul.f32 %v491_v11, %v269_v29 }
 0x2ff   :  { %v286_v33 = vsub.f32 0.0, %v282_v30  ;;  %v281_v34 = vmul.f32 %v495_v32, %v271_v31 }
 0x301   :  { %v288_v35 = vsel %vm284_vm2, %v282_v30, %v286_v33  ;;  %v283_v36 = vsub.f32 1.0, %v281_v34 }
 0x302   :  { %v290_v38 = vadd.f32 1.0, %v288_v35 }
 0x303   :  { %v287_v37 = vsub.f32 0.0, %v283_v36 }
 0x304   :  { %v292_v43 = vmul.f32 %v290_v38, %v242_v40 }
 0x305   :  { %v289_v39 = vsel %vm285_vm3, %v283_v36, %v287_v37 }
 0x306   :  { %v291_v42 = vadd.f32 1.0, %v289_v39 }
 0x308   :  { %v293_v44 = vmul.f32 %v291_v42, %v243_v41 }
 0x30a   :  { %v296_v45 = vpack.c.bf16 %v293_v44, %v292_v43 }
 0x30c   :  { %467 = vmatmul.mubr.msk.bf16.vlgmr.msra.gmra.mxu0 %vm329_vm4, %v296_v45 }
 0x3cc   :  { %v367_v47 = vpop.f32.mrf.mxu0 }
 0x3cd   :  { %v374_v48 = vadd.f32 %v367_v47, %v294_v46 }
 0x3ce   :  { %v468_v49 = vpop.f32.mrf.mxu0 }
 0x3cf   :  { %376 = vst.msk [vmem:[#allocation4] sm:$0xff] %vm71_vm1, %v374_v48 }
 0x3d0   :  { %v370_v51 = vpop.f32.mrf.mxu0 }
 0x3d1   :  { %v375_v52 = vadd.f32 %v370_v51, %v295_v50 }
 0x3d2   :  { %v469_v53 = vpop.f32.mrf.mxu0 }
 0x3d3   :  { %377 = vst.msk [vmem:[#allocation4 + $0x8] sm:$0xff] %vm71_vm1, %v375_v52 }
 0x3d6   :  { %v383_v55 = vld [vmem:[#allocation4] sm:$0xff] }
 0x3d7   :  { %v385_v57 = vadd.f32 %v383_v55, %v381_v54 }
 0x3d9   :  { %v394_v58 = vadd.f32 %v430_v56, %v385_v57 }
 0x3da   :  { %v384_v60 = vld [vmem:[#allocation4 + $0x8] sm:$0xff] }
 0x3db   :  { %v386_v61 = vadd.f32 %v384_v60, %v382_v59  ;;  %396 = vst.msk [vmem:[#allocation5] sm:$0xff] %vm71_vm1, %v394_v58 }
 0x3dd   :  { %v395_v62 = vadd.f32 %v430_v56, %v386_v61 }
 0x3df   :  { %397 = vst.msk [vmem:[#allocation5 + $0x8] sm:$0xff] %vm71_vm1, %v395_v62 }
 0x3e0   :  { %507 = shalt.err (!%p504_p4)
}
 0x3e1   :  { %s521_s9 = smov 128   ;;  %s522_s2 = smov 8  }
 0x3e2   :  { %409 = dma.vmem_to_hbm [thread:$0]  %s404_s17, 256, %s668_s10, [#allocation6], %s521_s9, %s521_s9, %s522_s2  }
 0x3e3   :  { %516 = dma.done.wait [#allocation6], 256  }
 0x3e4   :  { %517 = vsyncadd [#allocation6], 4294967040 }
 0x3e5   :  { %413 = vsyncpa [#allocation6], 1 }

</bundles_post_ra>
